<compile_context>
chip_gen: v5e
topology: v5e:2x2
jax: 0.10.0
libtpu: 0.0.40
codegen_flags: <defaults>
</compile_context>

<pallas_src>
import functools

import jax
import jax.numpy as jnp
from jax import lax
from jax.experimental import pallas as pl
from jax.experimental.pallas import tpu as pltpu


def _round_up(x, m):
    return ((x + m - 1) // m) * m


def _embedding_mlp_kernel(idx_ref, emb_ref, w1_ref, b1_ref, w2_ref, b2_ref,
                          out_ref, sum_ref, *, window):
    """One batch tile: gather+sum embedding rows, then Linear->ReLU->Linear.

    idx_ref : SMEM, flat (B_pad * window,) int32 token ids (scalar prefetch)
    emb_ref : VMEM (V, E_pad)      w1_ref: (E_pad, H_pad)   b1_ref: (1, H_pad)
    w2_ref  : VMEM (H_pad, L_pad)  b2_ref: (1, L_pad)
    out_ref : VMEM (TB, L_pad)     sum_ref: VMEM scratch (TB, E_pad)
    """
    i = pl.program_id(0)
    tb = out_ref.shape[0]
    e_pad = emb_ref.shape[1]

    # --- embedding gather + window sum -----------------------------------
    def per_row(b, carry):
        base = (i * tb + b) * window

        def per_tok(w, acc):
            tok = idx_ref[base + w]                      # scalar load from SMEM
            return acc + emb_ref[pl.ds(tok, 1), :]       # gather one table row

        row = lax.fori_loop(0, window, per_tok,
                            jnp.zeros((1, e_pad), jnp.float32),
                            unroll=True)
        sum_ref[pl.ds(b, 1), :] = row
        return carry

    lax.fori_loop(0, tb, per_row, 0)

    # --- MLP: Linear(E,64) -> ReLU -> Linear(64,L) (all dims lane-padded) -
    h = jnp.dot(sum_ref[...], w1_ref[...],
                preferred_element_type=jnp.float32) + b1_ref[...]
    h = jnp.maximum(h, 0.0)
    out = jnp.dot(h, w2_ref[...],
                  preferred_element_type=jnp.float32) + b2_ref[...]
    out_ref[...] = out.astype(out_ref.dtype)


def embedding_mlp(x, emb_table, w1, b1, w2, b2):
    """x: (B, W) int token ids; returns (B, label_size) float32.

    Weights are stored as (in_features, out_features), i.e. activations @ W + b,
    equivalent to PyTorch's x @ W.T with W of shape (out, in).
    """
    B, W = x.shape
    V, E = emb_table.shape
    H = w1.shape[1]
    L = w2.shape[1]

    LANE = 128
    E_pad = _round_up(E, LANE)
    H_pad = _round_up(H, LANE)
    L_pad = _round_up(L, LANE)

    TB = min(128, _round_up(B, 8))          # batch tile (multiple of 8 sublanes)
    B_pad = _round_up(B, TB)
    grid = (B_pad // TB,)

    f32 = jnp.float32
    emb_p = jnp.pad(emb_table.astype(f32), ((0, 0), (0, E_pad - E)))
    w1_p = jnp.pad(w1.astype(f32), ((0, E_pad - E), (0, H_pad - H)))
    b1_p = jnp.pad(b1.astype(f32), (0, H_pad - H)).reshape(1, H_pad)
    w2_p = jnp.pad(w2.astype(f32), ((0, H_pad - H), (0, L_pad - L)))
    b2_p = jnp.pad(b2.astype(f32), (0, L_pad - L)).reshape(1, L_pad)
    idx_flat = jnp.pad(x.reshape(-1).astype(jnp.int32), (0, (B_pad - B) * W))

    kernel = functools.partial(_embedding_mlp_kernel, window=W)

    cost = pl.CostEstimate(
        flops=2 * B_pad * (W * E_pad + E_pad * H_pad + H_pad * L_pad),
        transcendentals=0,
        bytes_accessed=4 * (emb_p.size + w1_p.size + b1_p.size + w2_p.size
                            + b2_p.size + idx_flat.size + B_pad * L_pad),
    )

    out = pl.pallas_call(
        kernel,
        out_shape=jax.ShapeDtypeStruct((B_pad, L_pad), jnp.float32),
        grid_spec=pltpu.PrefetchScalarGridSpec(
            num_scalar_prefetch=1,                       # idx_flat -> SMEM
            grid=grid,
            in_specs=[
                pl.BlockSpec((V, E_pad), lambda i, idx: (0, 0)),      # emb table
                pl.BlockSpec((E_pad, H_pad), lambda i, idx: (0, 0)),  # w1
                pl.BlockSpec((1, H_pad), lambda i, idx: (0, 0)),      # b1
                pl.BlockSpec((H_pad, L_pad), lambda i, idx: (0, 0)),  # w2
                pl.BlockSpec((1, L_pad), lambda i, idx: (0, 0)),      # b2
            ],
            out_specs=pl.BlockSpec((TB, L_pad), lambda i, idx: (i, 0)),
            scratch_shapes=[pltpu.VMEM((TB, E_pad), jnp.float32)],
        ),
        compiler_params=pltpu.CompilerParams(
            dimension_semantics=("parallel",),
        ),
        cost_estimate=cost,
    )(idx_flat, emb_p, w1_p, b1_p, w2_p, b2_p)

    return out[:B, :L]


def init_params(key, feature_in, embd_size, label_size):
    """Deterministic parameter init (shapes match the PyTorch module)."""
    k_emb, k_w1, k_b1, k_w2, k_b2 = jax.random.split(key, 5)
    emb_table = jax.random.normal(k_emb, (feature_in, embd_size), jnp.float32)
    lim1 = 1.0 / jnp.sqrt(embd_size)
    w1 = jax.random.uniform(k_w1, (embd_size, 64), jnp.float32, -lim1, lim1)
    b1 = jax.random.uniform(k_b1, (64,), jnp.float32, -lim1, lim1)
    lim2 = 1.0 / jnp.sqrt(64.0)
    w2 = jax.random.uniform(k_w2, (64, label_size), jnp.float32, -lim2, lim2)
    b2 = jax.random.uniform(k_b2, (label_size,), jnp.float32, -lim2, lim2)
    return emb_table, w1, b1, w2, b2


def reference(x, emb_table, w1, b1, w2, b2):
    """Pure-JAX reference matching the PyTorch forward semantics."""
    e = jnp.take(emb_table, x, axis=0)        # (B, W, E)
    s = e.sum(axis=1)                         # (B, E)
    h = jnp.maximum(s @ w1 + b1, 0.0)
    return h @ w2 + b2


if __name__ == "__main__":
    batch, window_size = 2, 8
    feature_in, embd_size, label_size = 16, 32, 4

    key = jax.random.PRNGKey(0)
    k_x, k_params = jax.random.split(key)
    x = jax.random.randint(k_x, (batch, window_size), 0, feature_in, dtype=jnp.int32)
    params = init_params(k_params, feature_in, embd_size, label_size)

    out = embedding_mlp(x, *params)
    out = jax.block_until_ready(out)

    ref = reference(x, *params)
    assert out.shape == (batch, label_size)
    assert jnp.allclose(out, ref, atol=1e-4, rtol=1e-4), (out, ref)
    print("KERNEL_OK")
</pallas_src>

<mosaic_0001>
module attributes {stable_mosaic.version = 11 : i64} {
  func.func @_embedding_mlp_kernel(%arg0: i32, %arg1: memref<64xi32, #tpu.memory_space<smem>>, %arg2: memref<16x128xf32, #tpu.memory_space<vmem>>, %arg3: memref<128x128xf32, #tpu.memory_space<vmem>>, %arg4: memref<1x128xf32, #tpu.memory_space<vmem>>, %arg5: memref<128x128xf32, #tpu.memory_space<vmem>>, %arg6: memref<1x128xf32, #tpu.memory_space<vmem>>, %arg7: memref<8x128xf32, #tpu.memory_space<vmem>>, %arg8: memref<8x128xf32, #tpu.memory_space<vmem>>) attributes {dimension_semantics = [#tpu.dimension_semantics<parallel>], iteration_bounds = array<i64: 1>, scalar_prefetch = 1 : i64, scratch_operands = 1 : i64, tpu.core_type = #tpu.core_type<tc>, window_params = [{pipeline_mode = #tpu.pipeline_mode<synchronous>, transform_indices = @transform_0, window_bounds = array<i64: 16, 128>}, {pipeline_mode = #tpu.pipeline_mode<synchronous>, transform_indices = @transform_1, window_bounds = array<i64: 128, 128>}, {pipeline_mode = #tpu.pipeline_mode<synchronous>, transform_indices = @transform_2, window_bounds = array<i64: 1, 128>}, {pipeline_mode = #tpu.pipeline_mode<synchronous>, transform_indices = @transform_3, window_bounds = array<i64: 128, 128>}, {pipeline_mode = #tpu.pipeline_mode<synchronous>, transform_indices = @transform_4, window_bounds = array<i64: 1, 128>}, {transform_indices = @transform_5, window_bounds = array<i64: 8, 128>}]} {
    %c0_i32 = arith.constant 0 : i32
    %c8_i32 = arith.constant 8 : i32
    %0 = arith.addi %c0_i32, %c8_i32 : i32
    %c1_i32 = arith.constant 1 : i32
    scf.for %arg9 = %c0_i32 to %0 step %c1_i32  : i32 {
      %c8_i32_14 = arith.constant 8 : i32
      %15 = arith.muli %arg0, %c8_i32_14 : i32
      %16 = arith.addi %15, %arg9 : i32
      %c8_i32_15 = arith.constant 8 : i32
      %17 = arith.muli %16, %c8_i32_15 : i32
      %cst_16 = arith.constant 0.000000e+00 : f32
      %18 = vector.broadcast %cst_16 : f32 to vector<1x128xf32>
      %c0_i32_17 = arith.constant 0 : i32
      %19 = arith.addi %17, %c0_i32_17 : i32
      %20 = arith.index_cast %19 : i32 to index
      %21 = memref.load %arg1[%20] : memref<64xi32, #tpu.memory_space<smem>>
      %22 = arith.index_cast %21 : i32 to index
      %c0_18 = arith.constant 0 : index
      %23 = vector.load %arg2[%22, %c0_18] : memref<16x128xf32, #tpu.memory_space<vmem>>, vector<1x128xf32>
      %24 = arith.addf %18, %23 : vector<1x128xf32>
      %c1_i32_19 = arith.constant 1 : i32
      %25 = arith.addi %17, %c1_i32_19 : i32
      %26 = arith.index_cast %25 : i32 to index
      %27 = memref.load %arg1[%26] : memref<64xi32, #tpu.memory_space<smem>>
      %28 = arith.index_cast %27 : i32 to index
      %c0_20 = arith.constant 0 : index
      %29 = vector.load %arg2[%28, %c0_20] : memref<16x128xf32, #tpu.memory_space<vmem>>, vector<1x128xf32>
      %30 = arith.addf %24, %29 : vector<1x128xf32>
      %c2_i32 = arith.constant 2 : i32
      %31 = arith.addi %17, %c2_i32 : i32
      %32 = arith.index_cast %31 : i32 to index
      %33 = memref.load %arg1[%32] : memref<64xi32, #tpu.memory_space<smem>>
      %34 = arith.index_cast %33 : i32 to index
      %c0_21 = arith.constant 0 : index
      %35 = vector.load %arg2[%34, %c0_21] : memref<16x128xf32, #tpu.memory_space<vmem>>, vector<1x128xf32>
      %36 = arith.addf %30, %35 : vector<1x128xf32>
      %c3_i32 = arith.constant 3 : i32
      %37 = arith.addi %17, %c3_i32 : i32
      %38 = arith.index_cast %37 : i32 to index
      %39 = memref.load %arg1[%38] : memref<64xi32, #tpu.memory_space<smem>>
      %40 = arith.index_cast %39 : i32 to index
      %c0_22 = arith.constant 0 : index
      %41 = vector.load %arg2[%40, %c0_22] : memref<16x128xf32, #tpu.memory_space<vmem>>, vector<1x128xf32>
      %42 = arith.addf %36, %41 : vector<1x128xf32>
      %c4_i32 = arith.constant 4 : i32
      %43 = arith.addi %17, %c4_i32 : i32
      %44 = arith.index_cast %43 : i32 to index
      %45 = memref.load %arg1[%44] : memref<64xi32, #tpu.memory_space<smem>>
      %46 = arith.index_cast %45 : i32 to index
      %c0_23 = arith.constant 0 : index
      %47 = vector.load %arg2[%46, %c0_23] : memref<16x128xf32, #tpu.memory_space<vmem>>, vector<1x128xf32>
      %48 = arith.addf %42, %47 : vector<1x128xf32>
      %c5_i32 = arith.constant 5 : i32
      %49 = arith.addi %17, %c5_i32 : i32
      %50 = arith.index_cast %49 : i32 to index
      %51 = memref.load %arg1[%50] : memref<64xi32, #tpu.memory_space<smem>>
      %52 = arith.index_cast %51 : i32 to index
      %c0_24 = arith.constant 0 : index
      %53 = vector.load %arg2[%52, %c0_24] : memref<16x128xf32, #tpu.memory_space<vmem>>, vector<1x128xf32>
      %54 = arith.addf %48, %53 : vector<1x128xf32>
      %c6_i32 = arith.constant 6 : i32
      %55 = arith.addi %17, %c6_i32 : i32
      %56 = arith.index_cast %55 : i32 to index
      %57 = memref.load %arg1[%56] : memref<64xi32, #tpu.memory_space<smem>>
      %58 = arith.index_cast %57 : i32 to index
      %c0_25 = arith.constant 0 : index
      %59 = vector.load %arg2[%58, %c0_25] : memref<16x128xf32, #tpu.memory_space<vmem>>, vector<1x128xf32>
      %60 = arith.addf %54, %59 : vector<1x128xf32>
      %c7_i32 = arith.constant 7 : i32
      %61 = arith.addi %17, %c7_i32 : i32
      %62 = arith.index_cast %61 : i32 to index
      %63 = memref.load %arg1[%62] : memref<64xi32, #tpu.memory_space<smem>>
      %64 = arith.index_cast %63 : i32 to index
      %c0_26 = arith.constant 0 : index
      %65 = vector.load %arg2[%64, %c0_26] : memref<16x128xf32, #tpu.memory_space<vmem>>, vector<1x128xf32>
      %66 = arith.addf %60, %65 : vector<1x128xf32>
      %c8_i32_27 = arith.constant 8 : i32
      %67 = arith.index_cast %arg9 : i32 to index
      %c0_28 = arith.constant 0 : index
      %68 = vector.load %arg8[%67, %c0_28] : memref<8x128xf32, #tpu.memory_space<vmem>>, vector<1x128xf32>
      tpu.vector_store %arg8[%67, %c0_28], %66 {strides = array<i32>} : memref<8x128xf32, #tpu.memory_space<vmem>>, vector<1x128xf32>,
    }
    %c8_i32_0 = arith.constant 8 : i32
    %c0 = arith.constant 0 : index
    %c0_1 = arith.constant 0 : index
    %1 = vector.load %arg8[%c0, %c0_1] : memref<8x128xf32, #tpu.memory_space<vmem>>, vector<8x128xf32>
    %c0_2 = arith.constant 0 : index
    %c0_3 = arith.constant 0 : index
    %2 = vector.load %arg3[%c0_2, %c0_3] : memref<128x128xf32, #tpu.memory_space<vmem>>, vector<128x128xf32>
    %cst = arith.constant dense<0.000000e+00> : vector<8x128xf32>
    %3 = tpu.matmul %1, %2, %cst {dimension_numbers = #tpu.dot_dimension_numbers<[1], [0], [0], [1], [0, 0, 1, 1], [], []>} : vector<8x128xf32>, vector<128x128xf32>, vector<8x128xf32> -> vector<8x128xf32>
    %c0_4 = arith.constant 0 : index
    %c0_5 = arith.constant 0 : index
    %4 = vector.load %arg4[%c0_4, %c0_5] : memref<1x128xf32, #tpu.memory_space<vmem>>, vector<1x128xf32>
    %5 = vector.broadcast %4 : vector<1x128xf32> to vector<8x128xf32>
    %6 = arith.addf %3, %5 : vector<8x128xf32>
    %cst_6 = arith.constant 0.000000e+00 : f32
    %7 = vector.broadcast %cst_6 : f32 to vector<8x128xf32>
    %8 = arith.maximumf %6, %7 : vector<8x128xf32>
    %c0_7 = arith.constant 0 : index
    %c0_8 = arith.constant 0 : index
    %9 = vector.load %arg5[%c0_7, %c0_8] : memref<128x128xf32, #tpu.memory_space<vmem>>, vector<128x128xf32>
    %cst_9 = arith.constant dense<0.000000e+00> : vector<8x128xf32>
    %10 = tpu.matmul %8, %9, %cst_9 {dimension_numbers = #tpu.dot_dimension_numbers<[1], [0], [0], [1], [0, 0, 1, 1], [], []>} : vector<8x128xf32>, vector<128x128xf32>, vector<8x128xf32> -> vector<8x128xf32>
    %c0_10 = arith.constant 0 : index
    %c0_11 = arith.constant 0 : index
    %11 = vector.load %arg6[%c0_10, %c0_11] : memref<1x128xf32, #tpu.memory_space<vmem>>, vector<1x128xf32>
    %12 = vector.broadcast %11 : vector<1x128xf32> to vector<8x128xf32>
    %13 = arith.addf %10, %12 : vector<8x128xf32>
    %c0_12 = arith.constant 0 : index
    %c0_13 = arith.constant 0 : index
    %14 = vector.load %arg7[%c0_12, %c0_13] : memref<8x128xf32, #tpu.memory_space<vmem>>, vector<8x128xf32>
    tpu.vector_store %arg7[%c0_12, %c0_13], %13 {strides = array<i32>} : memref<8x128xf32, #tpu.memory_space<vmem>>, vector<8x128xf32>,
    return
  }
  func.func @transform_0(%arg0: i32, %arg1: memref<64xi32, #tpu.memory_space<smem>>) -> (i32, i32) {
    %c0_i32 = arith.constant 0 : i32
    %c0_i32_0 = arith.constant 0 : i32
    %c0_i32_1 = arith.constant 0 : i32
    return %c0_i32, %c0_i32_0 : i32, i32
  }
  func.func @transform_1(%arg0: i32, %arg1: memref<64xi32, #tpu.memory_space<smem>>) -> (i32, i32) {
    %c0_i32 = arith.constant 0 : i32
    %c0_i32_0 = arith.constant 0 : i32
    %c0_i32_1 = arith.constant 0 : i32
    return %c0_i32, %c0_i32_0 : i32, i32
  }
  func.func @transform_2(%arg0: i32, %arg1: memref<64xi32, #tpu.memory_space<smem>>) -> (i32, i32) {
    %c0_i32 = arith.constant 0 : i32
    %c0_i32_0 = arith.constant 0 : i32
    %c0_i32_1 = arith.constant 0 : i32
    return %c0_i32, %c0_i32_0 : i32, i32
  }
  func.func @transform_3(%arg0: i32, %arg1: memref<64xi32, #tpu.memory_space<smem>>) -> (i32, i32) {
    %c0_i32 = arith.constant 0 : i32
    %c0_i32_0 = arith.constant 0 : i32
    %c0_i32_1 = arith.constant 0 : i32
    return %c0_i32, %c0_i32_0 : i32, i32
  }
  func.func @transform_4(%arg0: i32, %arg1: memref<64xi32, #tpu.memory_space<smem>>) -> (i32, i32) {
    %c0_i32 = arith.constant 0 : i32
    %c0_i32_0 = arith.constant 0 : i32
    %c0_i32_1 = arith.constant 0 : i32
    return %c0_i32, %c0_i32_0 : i32, i32
  }
  func.func @transform_5(%arg0: i32, %arg1: memref<64xi32, #tpu.memory_space<smem>>) -> (i32, i32) {
    %c0_i32 = arith.constant 0 : i32
    %c0_i32_0 = arith.constant 0 : i32
    return %arg0, %c0_i32 : i32, i32
  }
}

</mosaic_0001>

<bundles_post_ra>
// kernel: tpu_custom_call.1
= control target key start
LH: loop header
LB: loop body
LE: loop exit
PB: predicated region body
PF: predicated region fallthrough
CT: control target
= control target key end

     0   :  { %s384_s24 = smov [#allocation4]   ;;  %s457_s0 = inlined_call_operand.hbm [shape: s32[64], index: 0, kind: input, shape index: {}]   ;;  %s458_s1 = inlined_call_operand.hbm [shape: f32[16,128], index: 1, kind: input, shape index: {}]   ;;  %s459_s2 = inlined_call_operand.hbm [shape: f32[128,128], index: 2, kind: input, shape index: {}]   ;;  %s460_s3 = inlined_call_operand.vmem [shape: f32[1,128], index: 3, kind: input, shape index: {}]   ;;  %s461_s4 = inlined_call_operand.hbm [shape: f32[128,128], index: 4, kind: input, shape index: {}]   ;;  %s462_s5 = inlined_call_operand.vmem [shape: f32[1,128], index: 5, kind: input, shape index: {}]   ;;  %s463_s6 = inlined_call_operand.hbm [shape: f32[8,128], index: 6, kind: output, shape index: {}]  }
   0x1   :  { %s12_s23 = sshll.u32 %s457_s0, 4  ;;  %s13_s23 = int_to_ptr.hbm [resolvable:$true] %s12_s23 }
   0x2   :  { %15 = dma.hbm_to_smem %s13_s23, 16, %s384_s24, [#allocation3] }
   0x3   :  { %372 = dma.done.wait [#allocation3], 16 }
   0x4   :  { %373 = vsyncadd [#allocation3], 4294967280 }
   0x5   :  { %18 = sfence }
   0x6   :  { %19 = vsyncpa [#allocation6], 0 }
   0x7   :  { %20 = vsyncpa [#allocation9], 0 }
   0x8   :  { %21 = vsyncpa [#allocation7], 0  ;;  %s39_s27 = sshll.u32 %s459_s2, 4  ;;  %s385_s28 = smov [#allocation8]   ;;  %s40_s27 = int_to_ptr.hbm [resolvable:$true] %s39_s27 }
   0x9   :  { %s41_s29 = sshll.u32 %s385_s28, 4  ;;  %s26_s0 = sshll.u32 %s458_s1, 4  ;;  %s42_s29 = int_to_ptr.vmem [resolvable:$true] %s41_s29  ;;  %s27_s0 = int_to_ptr.hbm [resolvable:$true] %s26_s0 }
   0xa   :  { %s386_s8 = smov 128   ;;  %s387_s9 = smov 8  }
   0xb   :  { %47 = dma.hbm_to_vmem [thread:$0]  %s40_s27, 2048, %s42_s29, [#allocation9], %s386_s8, %s386_s8, %s387_s9  }
   0xc   :  { %s388_s10 = smov [#allocation5]   ;;  %s54_s14 = sshll.u32 %s461_s4, 4  ;;  %s55_s14 = int_to_ptr.hbm [resolvable:$true] %s54_s14 }
   0xd   :  { %s28_s11 = sshll.u32 %s388_s10, 4  ;;  %s389_s2 = smov [#allocation10]   ;;  %s29_s11 = int_to_ptr.vmem [resolvable:$true] %s28_s11 }
   0xe   :  { %34 = dma.hbm_to_vmem [thread:$0]  %s27_s0, 256, %s29_s11, [#allocation6], %s386_s8, %s386_s8, %s387_s9  }
   0xf   :  { %s56_s15 = sshll.u32 %s389_s2, 4  ;;  %s57_s15 = int_to_ptr.vmem [resolvable:$true] %s56_s15 }
  0x10   :  { %62 = dma.hbm_to_vmem [thread:$0]  %s55_s14, 2048, %s57_s15, [#allocation9], %s386_s8, %s386_s8, %s387_s9  }
  0x11   :  { %374 = dma.done.wait [#allocation6], 256  }
  0x12   :  { %375 = vsyncadd [#allocation6], 4294967040 }
  0x13   :  { %376 = dma.done.wait [#allocation9], 4096  }
  0x14   :  { %377 = vsyncadd [#allocation9], 4294963200  ;;  %s438_s1 = smov 0  }
  0x15 LB: > { %s242_s4 = sshll.u32 %s382_s1, 3  ;;  %s125_s14 = scalar_lea.vmem [#allocation2], %s382_s1  ;;  %s382_s1 = sphi %s438_s1, %s82_s1  }
  0x16   : > { %s86_s16 = sld [smem:[#allocation4 + %s242_s4]]  ;;  %s90_s17 = sadd.s32 1, %s242_s4 }
  0x17   : > { %s91_s18 = sld [smem:[#allocation4 + %s90_s17]]  ;;  %s95_s19 = sadd.s32 2, %s242_s4 }
  0x18   : > { %s96_s20 = sld [smem:[#allocation4 + %s95_s19]]  ;;  %s100_s21 = sadd.s32 3, %s242_s4 }
  0x19   : > { %s101_s22 = sld [smem:[#allocation4 + %s100_s21]]  ;;  %s105_s23 = sadd.s32 4, %s242_s4 }
  0x1a   : > { %s106_s24 = sld [smem:[#allocation4 + %s105_s23]]  ;;  %s110_s25 = sadd.s32 5, %s242_s4 }
  0x1b   : > { %s111_s26 = sld [smem:[#allocation4 + %s110_s25]]  ;;  %s115_s27 = sadd.s32 6, %s242_s4 }
  0x1c   : > { %s116_s28 = sld [smem:[#allocation4 + %s115_s27]]  ;;  %s87_s29 = scalar_lea.vmem [#allocation5], %s86_s16 }
  0x1d   : > { %v88_v0 = vld [vmem:[%s87_s29] sm:$0x1]  ;;  %s120_s30 = sadd.s32 7, %s242_s4  ;;  %s92_s7 = scalar_lea.vmem [#allocation5], %s91_s18 }
  0x1e   : > { %v93_v1 = vld [vmem:[%s92_s7] sm:$0x1]  ;;  %s121_s0 = sld [smem:[#allocation4 + %s120_s30]]  ;;  %s97_s8 = scalar_lea.vmem [#allocation5], %s96_s20 }
  0x1f   : > { %v94_v2 = vadd.f32 %v93_v1, %v88_v0  ;;  %v98_v3 = vld [vmem:[%s97_s8] sm:$0x1]  ;;  %s102_s9 = scalar_lea.vmem [#allocation5], %s101_s22  ;;  %s82_s1 = sadd.s32 1, %s382_s1  }
  0x20   : > { %v103_v4 = vld [vmem:[%s102_s9] sm:$0x1]  ;;  %s107_s10 = scalar_lea.vmem [#allocation5], %s106_s24  ;;  %p79_p0 = scmp.ge.s32.totalorder %s82_s1, 8  }
  0x21   : > { %v99_v5 = vadd.f32 %v98_v3, %v94_v2  ;;  %v108_v6 = vld [vmem:[%s107_s10] sm:$0x1]  ;;  %s112_s11 = scalar_lea.vmem [#allocation5], %s111_s26  ;;  %v143_v15 = vld [vmem:[#allocation8 + $0x78] sm:$0xff] (%p79_p0)  ;;  %v142_v16 = vld [vmem:[#allocation8 + $0x70] sm:$0xff] (%p79_p0)  ;;  %s390_s16 = smov (%p79_p0), [#allocation11]  }
  0x22   : > { %v113_v8 = vld [vmem:[%s112_s11] sm:$0x1]  ;;  %s117_s12 = scalar_lea.vmem [#allocation5], %s116_s28  ;;  %148 = vmatpush.msra.mxu0 (%p79_p0), %v143_v15  ;;  %v140_v18 = vld [vmem:[#allocation8 + $0x60] sm:$0xff] (%p79_p0)  ;;  %v184_v19 = vld [vmem:[#allocation10 + $0x78] sm:$0xff] (%p79_p0)  ;;  %s215_s17 = sshll.u32 (%p79_p0), %s390_s16, 4  ;;  %s216_s17 = int_to_ptr.vmem [resolvable:$true] %s215_s17 }
  0x23   : > { %v104_v7 = vadd.f32 %v103_v4, %v99_v5  ;;  %v118_v10 = vld [vmem:[%s117_s12] sm:$0x1]  ;;  %v139_v20 = vld [vmem:[#allocation8 + $0x58] sm:$0xff] (%p79_p0)  ;;  %189 = vmatpush.msra.mxu1 (%p79_p0), %v184_v19  ;;  %v183_v21 = vld [vmem:[#allocation10 + $0x70] sm:$0xff] (%p79_p0)  ;;  %s217_s20 = sshll.u32 (%p79_p0), %s463_s6, 4  ;;  %s218_s20 = int_to_ptr.hbm [resolvable:$true] %s217_s20 }
  0x24   : > { %s122_s13 = scalar_lea.vmem [#allocation5], %s121_s0  ;;  %v141_v17 = vld [vmem:[#allocation8 + $0x68] sm:$0xff] (%p79_p0)  ;;  %149 = vmatpush.msra.mxu0 (%p79_p0), %v142_v16  ;;  %v138_v23 = vld [vmem:[#allocation8 + $0x50] sm:$0xff] (%p79_p0)  ;;  %v181_v24 = vld [vmem:[#allocation10 + $0x60] sm:$0xff] (%p79_p0) }
  0x25   : > { %v109_v9 = vadd.f32 %v108_v6, %v104_v7  ;;  %v123_v12 = vld [vmem:[%s122_s13] sm:$0x1]  ;;  %190 = vmatpush.msra.mxu1 (%p79_p0), %v183_v21  ;;  %v180_v26 = vld [vmem:[#allocation10 + $0x58] sm:$0xff] (%p79_p0)  ;;  %v136_v27 = vld [vmem:[#allocation8 + $0x40] sm:$0xff] (%p79_p0) }
  0x26   :  { %150 = vmatpush.msra.mxu0 (%p79_p0), %v141_v17  ;;  %v182_v22 = vld [vmem:[#allocation10 + $0x68] sm:$0xff] (%p79_p0)  ;;  %v179_v28 = vld [vmem:[#allocation10 + $0x50] sm:$0xff] (%p79_p0)  ;;  %v135_v29 = vld [vmem:[#allocation8 + $0x38] sm:$0xff] (%p79_p0) }
  0x27   : > { %v114_v11 = vadd.f32 %v113_v8, %v109_v9  ;;  %v137_v25 = vld [vmem:[#allocation8 + $0x48] sm:$0xff] (%p79_p0)  ;;  %191 = vmatpush.msra.mxu1 (%p79_p0), %v182_v22  ;;  %v134_v31 = vld [vmem:[#allocation8 + $0x30] sm:$0xff] (%p79_p0)  ;;  %v177_v32 = vld [vmem:[#allocation10 + $0x40] sm:$0xff] (%p79_p0) }
  0x28   :  { %151 = vmatpush.msra.mxu0 (%p79_p0), %v140_v18  ;;  %v178_v30 = vld [vmem:[#allocation10 + $0x48] sm:$0xff] (%p79_p0)  ;;  %v176_v34 = vld [vmem:[#allocation10 + $0x38] sm:$0xff] (%p79_p0)  ;;  %v132_v35 = vld [vmem:[#allocation8 + $0x20] sm:$0xff] (%p79_p0) }
  0x29   : > { %v119_v13 = vadd.f32 %v118_v10, %v114_v11  ;;  %81 = sbr.rel (!%p79_p0) target bundleno = 21 (0x15), region = 68  ;;  %192 = vmatpush.msra.mxu1 (%p79_p0), %v181_v24  ;;  %v133_v33 = vld [vmem:[#allocation8 + $0x28] sm:$0xff] (%p79_p0)  ;;  %v175_v36 = vld [vmem:[#allocation10 + $0x30] sm:$0xff] (%p79_p0)  ;;  %v131_v37 = vld [vmem:[#allocation8 + $0x18] sm:$0xff] (%p79_p0) }
  0x2a   :  { %152 = vmatpush.msra.mxu0 (%p79_p0), %v139_v20  ;;  %v174_v38 = vld [vmem:[#allocation10 + $0x28] sm:$0xff] (%p79_p0)  ;;  %v130_v39 = vld [vmem:[#allocation8 + $0x10] sm:$0xff] (%p79_p0)  ;;  %v173_v40 = vld [vmem:[#allocation10 + $0x20] sm:$0xff] (%p79_p0) }
  0x2b   : > { %v124_v14 = vadd.f32 %v123_v12, %v119_v13  ;;  %193 = vmatpush.msra.mxu1 (%p79_p0), %v180_v26  ;;  %v129_v41 = vld [vmem:[#allocation8 + $0x8] sm:$0xff] (%p79_p0)  ;;  %v172_v42 = vld [vmem:[#allocation10 + $0x18] sm:$0xff] (%p79_p0)  ;;  %v128_v43 = vld [vmem:[#allocation8] sm:$0xff] (%p79_p0) }
  0x2c   :  { %153 = vmatpush.msra.mxu0 (%p79_p0), %v138_v23  ;;  %v171_v45 = vld [vmem:[#allocation10 + $0x10] sm:$0xff] (%p79_p0)  ;;  %v170_v46 = vld [vmem:[#allocation10 + $0x8] sm:$0xff] (%p79_p0)  ;;  %v169_v47 = vld [vmem:[#allocation10] sm:$0xff] (%p79_p0) }
  0x2d   : > { %126 = vst [vmem:[%s125_s14] sm:$0x1] %v124_v14  ;;  %194 = vmatpush.msra.mxu1 (%p79_p0), %v179_v28  ;;  %v258_v48 = vld [vmem:[%s460_s3] ss:$0 sm:$0xff] (%p79_p0) }
  0x2e   :  { %154 = vmatpush.msra.mxu0 %v137_v25  ;;  %v259_v52 = vld [vmem:[%s462_s5] ss:$0 sm:$0xff] }
  0x2f   :  { %195 = vmatpush.msra.mxu1 %v178_v30 }
  0x30   :  { %155 = vmatpush.msra.mxu0 %v136_v27 }
  0x31   :  { %196 = vmatpush.msra.mxu1 %v177_v32 }
  0x32   :  { %156 = vmatpush.msra.mxu0 %v135_v29 }
  0x33   :  { %197 = vmatpush.msra.mxu1 %v176_v34 }
  0x34   :  { %157 = vmatpush.msra.mxu0 %v134_v31  ;;  %v127_v44 = vld [vmem:[#allocation2] sm:$0xff] }
  0x35   :  { %198 = vmatpush.msra.mxu1 %v175_v36 }
  0x36   :  { %158 = vmatpush.msra.mxu0 %v133_v33 }
  0x37   :  { %199 = vmatpush.msra.mxu1 %v174_v38 }
  0x38   :  { %159 = vmatpush.msra.mxu0 %v132_v35 }
  0x39   :  { %200 = vmatpush.msra.mxu1 %v173_v40 }
  0x3a   :  { %160 = vmatpush.msra.mxu0 %v131_v37 }
  0x3b   :  { %201 = vmatpush.msra.mxu1 %v172_v42 }
  0x3c   :  { %161 = vmatpush.msra.mxu0 %v130_v39 }
  0x3d   :  { %202 = vmatpush.msra.mxu1 %v171_v45 }
  0x3e   :  { %162 = vmatpush.msra.mxu0 %v129_v41 }
  0x3f   :  { %203 = vmatpush.msra.mxu1 %v170_v46 }
  0x40   :  { %163 = vmatpush.msra.mxu0 %v128_v43 }
  0x41   :  { %164 = vmatmul.f32.vlgmr.msra.gmra.mxu0 %v127_v44  ;;  %204 = vmatpush.msra.mxu1 %v169_v47 }
  0xbe   :  { %v165_v49 = vpop.f32.mrf.mxu0 }
  0xbf   :  { %v166_v50 = vadd.f32 %v258_v48, %v165_v49 }
  0xc1   :  { %v168_v51 = vmax.f32 %v166_v50, 0.0 }
  0xc3   :  { %205 = vmatmul.f32.vlgmr.msra.gmra.mxu1 %v168_v51 }
 0x140   :  { %v206_v53 = vpop.f32.mrf.mxu1 }
 0x141   :  { %v207_v54 = vadd.f32 %v259_v52, %v206_v53 }
 0x143   :  { %209 = vst [vmem:[#allocation11] sm:$0xff] %v207_v54 }
 0x144   :  { %220 = dma.vmem_to_hbm [thread:$0]  %s216_s17, 128, %s218_s20, [#allocation7]  }
 0x145   :  { %378 = dma.done.wait [#allocation7], 128  }
 0x146   :  { %379 = vsyncadd [#allocation7], 4294967168 }
 0x147   :  { %225 = vsyncpa [#allocation6], 1 }
 0x148   :  { %226 = vsyncpa [#allocation9], 1 }
 0x149   :  { %227 = vsyncpa [#allocation7], 1 }

</bundles_post_ra>
